<compile_context>
chip_gen: v6e
topology: v6e:2x2x1
jax: 0.10.0
libtpu: 0.0.40
codegen_flags: <defaults>
</compile_context>

<pallas_src>
import functools

import jax
import jax.numpy as jnp
from jax.experimental import pallas as pl
from jax.experimental.pallas import tpu as pltpu


_VMEM_LIMIT_BYTES = 48 * 1024 * 1024  # safe on v5e/v6e (128 MiB) and v7x (64 MiB)


def _round_up(x, m):
    return ((x + m - 1) // m) * m


def _sublane_tile(n, preferred=256):
    """Row tile: multiple of 8 dividing n (else n itself, which is also legal)."""
    t = preferred
    while t >= 8:
        if t <= n and n % t == 0:
            return t
        t //= 2
    return n


def _lane_tile(n, preferred=512):
    """Contraction tile: multiple of 128 dividing n (256-friendly for v6e/v7x
    MXU), else the full dimension."""
    t = preferred
    while t >= 128:
        if t <= n and n % t == 0:
            return t
        t //= 2
    return n


# ---------------------------------------------------------------------------
# Kernels
# ---------------------------------------------------------------------------
def _linear_kernel(x_ref, w_ref, b_ref, h_ref):
    # x_ref: (TM, Fin) f32 ; w_ref: (Fin, Fout_p) f32 ; b_ref: (1, Fout_p) f32
    # h_ref: (TM, Fout_p) agg_dtype
    h = jnp.dot(x_ref[...], w_ref[...], preferred_element_type=jnp.float32)
    h = h + b_ref[...]                       # bias added once, in f32
    h_ref[...] = h.astype(h_ref.dtype)


def _agg_shared_kernel(adj_ref, h_ref, o_ref, acc_ref):
    # Shared 2-D adjacency: grid = (N//TM, N//TK); adj streamed exactly once.
    # adj_ref: (TM, TK) agg_dtype
    # h_ref  : (B, TK, Fout_p) agg_dtype
    # o_ref  : (B, TM, Fout_p) f32
    # acc_ref: (B, TM, Fout_p) f32 scratch accumulator
    k = pl.program_id(1)

    @pl.when(k == 0)
    def _init():
        acc_ref[...] = jnp.zeros_like(acc_ref)

    adj_t = adj_ref[...]
    n_batch = h_ref.shape[0]
    # Static unroll over the (small) batch; for very large B add a batch-tile
    # grid axis instead of growing this block.
    for b in range(n_batch):
        acc_ref[b] = acc_ref[b] + jnp.dot(
            adj_t, h_ref[b], preferred_element_type=jnp.float32)

    @pl.when(k == pl.num_programs(1) - 1)
    def _finish():
        # TODO(synk): activation_class is generic in the PyTorch module; ReLU
        # is hard-coded here.
        o_ref[...] = jnp.maximum(acc_ref[...], 0.0).astype(o_ref.dtype)


def _agg_batched_kernel(adj_ref, h_ref, o_ref, acc_ref):
    # Per-batch 3-D adjacency: grid = (B, N//TM, N//TK).
    # adj_ref: (TM, TK) ; h_ref: (TK, Fout_p) ; o_ref/acc_ref: (TM, Fout_p)
    k = pl.program_id(2)

    @pl.when(k == 0)
    def _init():
        acc_ref[...] = jnp.zeros_like(acc_ref)

    acc_ref[...] += jnp.dot(adj_ref[...], h_ref[...],
                            preferred_element_type=jnp.float32)

    @pl.when(k == pl.num_programs(2) - 1)
    def _finish():
        o_ref[...] = jnp.maximum(acc_ref[...], 0.0).astype(o_ref.dtype)


# ---------------------------------------------------------------------------
# Wrapper
# ---------------------------------------------------------------------------
def prepare_params(weight, bias):
    """One-time host-side prep: transpose W to (Fin, Fout) and zero-pad Fout to
    a multiple of 128 so output stores are lane-dense."""
    out_features, in_features = weight.shape
    fout_p = _round_up(out_features, 128)
    w_t = jnp.zeros((in_features, fout_p), jnp.float32)
    w_t = w_t.at[:, :out_features].set(weight.T.astype(jnp.float32))
    b_row = jnp.zeros((1, fout_p), jnp.float32)
    b_row = b_row.at[:, :out_features].set(bias.astype(jnp.float32))
    return w_t, b_row


@functools.partial(jax.jit, static_argnames=("out_features", "agg_dtype"))
def graph_conv_layer(x, adj, w_t, b_row, *, out_features,
                     agg_dtype=jnp.bfloat16):
    """x: (B, N, Fin) f32; adj: (N, N) or (B, N, N);
    w_t: (Fin, Fout_p) f32 pre-transposed/padded; b_row: (1, Fout_p) f32."""
    B, N, Fin = x.shape
    fout_p = w_t.shape[1]
    tm = _sublane_tile(N)      # row tile
    tk = _lane_tile(N)         # contraction tile (256-aligned when possible)

    cparams_2d = pltpu.CompilerParams(
        dimension_semantics=("parallel", "parallel"),
        vmem_limit_bytes=_VMEM_LIMIT_BYTES)

    # ---- Stage 1: h = x @ W^T + b, once per batch (hoisted) ----
    h = pl.pallas_call(
        _linear_kernel,
        out_shape=jax.ShapeDtypeStruct((B, N, fout_p), agg_dtype),
        grid_spec=pltpu.PrefetchScalarGridSpec(
            num_scalar_prefetch=0,
            grid=(B, N // tm),
            in_specs=[
                pl.BlockSpec((None, tm, Fin), lambda b, i: (b, i, 0)),
                pl.BlockSpec((Fin, fout_p), lambda b, i: (0, 0)),
                pl.BlockSpec((1, fout_p), lambda b, i: (0, 0)),
            ],
            out_specs=pl.BlockSpec((None, tm, fout_p), lambda b, i: (b, i, 0)),
        ),
        compiler_params=cparams_2d,
    )(x.astype(jnp.float32), w_t, b_row)

    adj_c = adj.astype(agg_dtype)

    # ---- Stage 2: out = relu(adj @ h) ----
    if adj.ndim == 2:
        # Shared adjacency: no broadcast materialization, adj read once.
        out_p = pl.pallas_call(
            _agg_shared_kernel,
            out_shape=jax.ShapeDtypeStruct((B, N, fout_p), jnp.float32),
            grid_spec=pltpu.PrefetchScalarGridSpec(
                num_scalar_prefetch=0,
                grid=(N // tm, N // tk),
                in_specs=[
                    pl.BlockSpec((tm, tk), lambda i, k: (i, k)),
                    pl.BlockSpec((B, tk, fout_p), lambda i, k: (0, k, 0)),
                ],
                out_specs=pl.BlockSpec((B, tm, fout_p), lambda i, k: (0, i, 0)),
                scratch_shapes=[pltpu.VMEM((B, tm, fout_p), jnp.float32)],
            ),
            compiler_params=pltpu.CompilerParams(
                dimension_semantics=("parallel", "arbitrary"),
                vmem_limit_bytes=_VMEM_LIMIT_BYTES),
        )(adj_c, h)
    else:
        # True per-batch adjacency.
        out_p = pl.pallas_call(
            _agg_batched_kernel,
            out_shape=jax.ShapeDtypeStruct((B, N, fout_p), jnp.float32),
            grid_spec=pltpu.PrefetchScalarGridSpec(
                num_scalar_prefetch=0,
                grid=(B, N // tm, N // tk),
                in_specs=[
                    pl.BlockSpec((None, tm, tk), lambda b, i, k: (b, i, k)),
                    pl.BlockSpec((None, tk, fout_p), lambda b, i, k: (b, k, 0)),
                ],
                out_specs=pl.BlockSpec((None, tm, fout_p),
                                       lambda b, i, k: (b, i, 0)),
                scratch_shapes=[pltpu.VMEM((tm, fout_p), jnp.float32)],
            ),
            compiler_params=pltpu.CompilerParams(
                dimension_semantics=("parallel", "parallel", "arbitrary"),
                vmem_limit_bytes=_VMEM_LIMIT_BYTES),
        )(adj_c, h)

    if out_features != fout_p:
        out_p = out_p[..., :out_features]
    return out_p


# ---------------------------------------------------------------------------
# Pure-JAX reference (mirrors the PyTorch forward)
# ---------------------------------------------------------------------------
def _reference(x, adj, weight, bias):
    h = jnp.einsum("bnf,of->bno", x, weight) + bias
    if adj.ndim == 2:
        adj = jnp.broadcast_to(adj[None], (x.shape[0],) + adj.shape)
    out = jnp.einsum("bnm,bmo->bno", adj, h)
    return jnp.maximum(out, 0.0)


if __name__ == "__main__":
    key = jax.random.PRNGKey(0)
    B, N, Fin, Fout = 2, 8, 16, 32

    k_x, k_adj, k_w, k_b, k_adj3 = jax.random.split(key, 5)
    x = jax.random.normal(k_x, (B, N, Fin), dtype=jnp.float32)
    adj = (jax.random.uniform(k_adj, (N, N)) > 0.5).astype(jnp.float32)

    # Deterministic nn.Linear-style init: U(-1/sqrt(Fin), 1/sqrt(Fin)).
    bound = 1.0 / jnp.sqrt(jnp.float32(Fin))
    weight = jax.random.uniform(k_w, (Fout, Fin), minval=-bound, maxval=bound,
                                dtype=jnp.float32)
    bias = jax.random.uniform(k_b, (Fout,), minval=-bound, maxval=bound,
                              dtype=jnp.float32)

    w_t, b_row = prepare_params(weight, bias)   # one-time host-side prep
    ref2 = _reference(x, adj, weight, bias)

    # Exact f32 path, shared (2-D) adjacency.
    out_exact = jax.block_until_ready(
        graph_conv_layer(x, adj, w_t, b_row, out_features=Fout,
                         agg_dtype=jnp.float32))
    assert out_exact.shape == (B, N, Fout)
    assert jnp.allclose(out_exact, ref2, atol=1e-5, rtol=1e-5), "f32 mismatch"

    # Fast path: adj / h streams in bf16, f32 accumulation.
    out_fast = jax.block_until_ready(
        graph_conv_layer(x, adj, w_t, b_row, out_features=Fout,
                         agg_dtype=jnp.bfloat16))
    assert jnp.allclose(out_fast, ref2, atol=5e-2, rtol=5e-2), "bf16 mismatch"

    # Per-batch (3-D) adjacency path.
    adj3 = (jax.random.uniform(k_adj3, (B, N, N)) > 0.5).astype(jnp.float32)
    ref3 = _reference(x, adj3, weight, bias)
    out3 = jax.block_until_ready(
        graph_conv_layer(x, adj3, w_t, b_row, out_features=Fout,
                         agg_dtype=jnp.float32))
    assert jnp.allclose(out3, ref3, atol=1e-5, rtol=1e-5), "3-D adj mismatch"

    print("KERNEL_OK")
</pallas_src>

<mosaic_0001>
module attributes {stable_mosaic.version = 11 : i64} {
  func.func @_linear_kernel(%arg0: i32, %arg1: i32, %arg2: memref<1x8x16xf32, #tpu.memory_space<vmem>>, %arg3: memref<16x128xf32, #tpu.memory_space<vmem>>, %arg4: memref<1x128xf32, #tpu.memory_space<vmem>>, %arg5: memref<1x8x128xf32, #tpu.memory_space<vmem>>) attributes {dimension_semantics = [#tpu.dimension_semantics<parallel>, #tpu.dimension_semantics<parallel>], iteration_bounds = array<i64: 2, 1>, scalar_prefetch = 0 : i64, scratch_operands = 0 : i64, tpu.core_type = #tpu.core_type<tc>, window_params = [{transform_indices = @transform_0, window_bounds = array<i64: 1, 8, 16>}, {pipeline_mode = #tpu.pipeline_mode<synchronous>, transform_indices = @transform_1, window_bounds = array<i64: 16, 128>}, {pipeline_mode = #tpu.pipeline_mode<synchronous>, transform_indices = @transform_2, window_bounds = array<i64: 1, 128>}, {transform_indices = @transform_3, window_bounds = array<i64: 1, 8, 128>}]} {
    %c0 = arith.constant 0 : index
    %c0_0 = arith.constant 0 : index
    %c0_1 = arith.constant 0 : index
    %0 = vector.load %arg2[%c0, %c0_0, %c0_1] : memref<1x8x16xf32, #tpu.memory_space<vmem>>, vector<1x8x16xf32>
    %1 = vector.shape_cast %0 : vector<1x8x16xf32> to vector<8x16xf32>
    %c0_2 = arith.constant 0 : index
    %c0_3 = arith.constant 0 : index
    %2 = vector.load %arg3[%c0_2, %c0_3] : memref<16x128xf32, #tpu.memory_space<vmem>>, vector<16x128xf32>
    %cst = arith.constant dense<0.000000e+00> : vector<8x128xf32>
    %3 = tpu.matmul %1, %2, %cst {dimension_numbers = #tpu.dot_dimension_numbers<[1], [0], [0], [1], [0, 0, 1, 1], [], []>} : vector<8x16xf32>, vector<16x128xf32>, vector<8x128xf32> -> vector<8x128xf32>
    %c0_4 = arith.constant 0 : index
    %c0_5 = arith.constant 0 : index
    %4 = vector.load %arg4[%c0_4, %c0_5] : memref<1x128xf32, #tpu.memory_space<vmem>>, vector<1x128xf32>
    %5 = vector.broadcast %4 : vector<1x128xf32> to vector<8x128xf32>
    %6 = arith.addf %3, %5 : vector<8x128xf32>
    %c0_6 = arith.constant 0 : index
    %c0_7 = arith.constant 0 : index
    %c0_8 = arith.constant 0 : index
    %7 = vector.load %arg5[%c0_6, %c0_7, %c0_8] : memref<1x8x128xf32, #tpu.memory_space<vmem>>, vector<1x8x128xf32>
    %8 = vector.shape_cast %7 : vector<1x8x128xf32> to vector<8x128xf32>
    %9 = vector.shape_cast %6 : vector<8x128xf32> to vector<1x8x128xf32>
    tpu.vector_store %arg5[%c0_6, %c0_7, %c0_8], %9 {strides = array<i32>} : memref<1x8x128xf32, #tpu.memory_space<vmem>>, vector<1x8x128xf32>,
    return
  }
  func.func @transform_0(%arg0: i32, %arg1: i32) -> (i32, i32, i32) {
    %c0_i32 = arith.constant 0 : i32
    %c0_i32_0 = arith.constant 0 : i32
    return %arg0, %arg1, %c0_i32 : i32, i32, i32
  }
  func.func @transform_1(%arg0: i32, %arg1: i32) -> (i32, i32) {
    %c0_i32 = arith.constant 0 : i32
    %c0_i32_0 = arith.constant 0 : i32
    %c0_i32_1 = arith.constant 0 : i32
    return %c0_i32, %c0_i32_0 : i32, i32
  }
  func.func @transform_2(%arg0: i32, %arg1: i32) -> (i32, i32) {
    %c0_i32 = arith.constant 0 : i32
    %c0_i32_0 = arith.constant 0 : i32
    %c0_i32_1 = arith.constant 0 : i32
    return %c0_i32, %c0_i32_0 : i32, i32
  }
  func.func @transform_3(%arg0: i32, %arg1: i32) -> (i32, i32, i32) {
    %c0_i32 = arith.constant 0 : i32
    %c0_i32_0 = arith.constant 0 : i32
    return %arg0, %arg1, %c0_i32 : i32, i32, i32
  }
}

module attributes {stable_mosaic.version = 11 : i64} {
  func.func @_agg_shared_kernel(%arg0: i32, %arg1: i32, %arg2: memref<8x8xf32, #tpu.memory_space<vmem>>, %arg3: memref<2x8x128xf32, #tpu.memory_space<vmem>>, %arg4: memref<2x8x128xf32, #tpu.memory_space<vmem>>, %arg5: memref<2x8x128xf32, #tpu.memory_space<vmem>>) attributes {dimension_semantics = [#tpu.dimension_semantics<parallel>, #tpu.dimension_semantics<arbitrary>], iteration_bounds = array<i64: 1, 1>, scalar_prefetch = 0 : i64, scratch_operands = 1 : i64, tpu.core_type = #tpu.core_type<tc>, window_params = [{transform_indices = @transform_0, window_bounds = array<i64: 8, 8>}, {transform_indices = @transform_1, window_bounds = array<i64: 2, 8, 128>}, {transform_indices = @transform_2, window_bounds = array<i64: 2, 8, 128>}]} {
    %c0_i32 = arith.constant 0 : i32
    %0 = arith.cmpi eq, %arg1, %c0_i32 : i32
    %1 = arith.extui %0 : i1 to i32
    %c0_i32_0 = arith.constant 0 : i32
    %2 = arith.cmpi ne, %1, %c0_i32_0 : i32
    scf.if %2 {
      %cst_22 = arith.constant 0.000000e+00 : f32
      %25 = vector.broadcast %cst_22 : f32 to vector<2x8x128xf32>
      %c0_23 = arith.constant 0 : index
      %c0_24 = arith.constant 0 : index
      %c0_25 = arith.constant 0 : index
      %26 = vector.load %arg5[%c0_23, %c0_24, %c0_25] : memref<2x8x128xf32, #tpu.memory_space<vmem>>, vector<2x8x128xf32>
      tpu.vector_store %arg5[%c0_23, %c0_24, %c0_25], %25 {strides = array<i32>} : memref<2x8x128xf32, #tpu.memory_space<vmem>>, vector<2x8x128xf32>,
    } else {
    }
    %c0 = arith.constant 0 : index
    %c0_1 = arith.constant 0 : index
    %3 = vector.load %arg2[%c0, %c0_1] : memref<8x8xf32, #tpu.memory_space<vmem>>, vector<8x8xf32>
    %c0_2 = arith.constant 0 : index
    %c0_3 = arith.constant 0 : index
    %c0_4 = arith.constant 0 : index
    %4 = vector.load %arg5[%c0_2, %c0_3, %c0_4] : memref<2x8x128xf32, #tpu.memory_space<vmem>>, vector<1x8x128xf32>
    %5 = vector.shape_cast %4 : vector<1x8x128xf32> to vector<8x128xf32>
    %c0_5 = arith.constant 0 : index
    %c0_6 = arith.constant 0 : index
    %c0_7 = arith.constant 0 : index
    %6 = vector.load %arg3[%c0_5, %c0_6, %c0_7] : memref<2x8x128xf32, #tpu.memory_space<vmem>>, vector<1x8x128xf32>
    %7 = vector.shape_cast %6 : vector<1x8x128xf32> to vector<8x128xf32>
    %cst = arith.constant dense<0.000000e+00> : vector<8x128xf32>
    %8 = tpu.matmul %3, %7, %cst {dimension_numbers = #tpu.dot_dimension_numbers<[1], [0], [0], [1], [0, 0, 1, 1], [], []>} : vector<8x8xf32>, vector<8x128xf32>, vector<8x128xf32> -> vector<8x128xf32>
    %9 = arith.addf %5, %8 : vector<8x128xf32>
    %c0_8 = arith.constant 0 : index
    %c0_9 = arith.constant 0 : index
    %c0_10 = arith.constant 0 : index
    %10 = vector.load %arg5[%c0_8, %c0_9, %c0_10] : memref<2x8x128xf32, #tpu.memory_space<vmem>>, vector<1x8x128xf32>
    %11 = vector.shape_cast %10 : vector<1x8x128xf32> to vector<8x128xf32>
    %12 = vector.shape_cast %9 : vector<8x128xf32> to vector<1x8x128xf32>
    tpu.vector_store %arg5[%c0_8, %c0_9, %c0_10], %12 {strides = array<i32>} : memref<2x8x128xf32, #tpu.memory_space<vmem>>, vector<1x8x128xf32>,
    %c1 = arith.constant 1 : index
    %c0_11 = arith.constant 0 : index
    %c0_12 = arith.constant 0 : index
    %13 = vector.load %arg5[%c1, %c0_11, %c0_12] : memref<2x8x128xf32, #tpu.memory_space<vmem>>, vector<1x8x128xf32>
    %14 = vector.shape_cast %13 : vector<1x8x128xf32> to vector<8x128xf32>
    %c1_13 = arith.constant 1 : index
    %c0_14 = arith.constant 0 : index
    %c0_15 = arith.constant 0 : index
    %15 = vector.load %arg3[%c1_13, %c0_14, %c0_15] : memref<2x8x128xf32, #tpu.memory_space<vmem>>, vector<1x8x128xf32>
    %16 = vector.shape_cast %15 : vector<1x8x128xf32> to vector<8x128xf32>
    %cst_16 = arith.constant dense<0.000000e+00> : vector<8x128xf32>
    %17 = tpu.matmul %3, %16, %cst_16 {dimension_numbers = #tpu.dot_dimension_numbers<[1], [0], [0], [1], [0, 0, 1, 1], [], []>} : vector<8x8xf32>, vector<8x128xf32>, vector<8x128xf32> -> vector<8x128xf32>
    %18 = arith.addf %14, %17 : vector<8x128xf32>
    %c1_17 = arith.constant 1 : index
    %c0_18 = arith.constant 0 : index
    %c0_19 = arith.constant 0 : index
    %19 = vector.load %arg5[%c1_17, %c0_18, %c0_19] : memref<2x8x128xf32, #tpu.memory_space<vmem>>, vector<1x8x128xf32>
    %20 = vector.shape_cast %19 : vector<1x8x128xf32> to vector<8x128xf32>
    %21 = vector.shape_cast %18 : vector<8x128xf32> to vector<1x8x128xf32>
    tpu.vector_store %arg5[%c1_17, %c0_18, %c0_19], %21 {strides = array<i32>} : memref<2x8x128xf32, #tpu.memory_space<vmem>>, vector<1x8x128xf32>,
    %c0_i32_20 = arith.constant 0 : i32
    %22 = arith.cmpi eq, %arg1, %c0_i32_20 : i32
    %23 = arith.extui %22 : i1 to i32
    %c0_i32_21 = arith.constant 0 : i32
    %24 = arith.cmpi ne, %23, %c0_i32_21 : i32
    scf.if %24 {
      %c0_22 = arith.constant 0 : index
      %c0_23 = arith.constant 0 : index
      %c0_24 = arith.constant 0 : index
      %25 = vector.load %arg5[%c0_22, %c0_23, %c0_24] : memref<2x8x128xf32, #tpu.memory_space<vmem>>, vector<2x8x128xf32>
      %cst_25 = arith.constant 0.000000e+00 : f32
      %26 = vector.broadcast %cst_25 : f32 to vector<2x8x128xf32>
      %27 = arith.maximumf %25, %26 : vector<2x8x128xf32>
      %c0_26 = arith.constant 0 : index
      %c0_27 = arith.constant 0 : index
      %c0_28 = arith.constant 0 : index
      %28 = vector.load %arg4[%c0_26, %c0_27, %c0_28] : memref<2x8x128xf32, #tpu.memory_space<vmem>>, vector<2x8x128xf32>
      tpu.vector_store %arg4[%c0_26, %c0_27, %c0_28], %27 {strides = array<i32>} : memref<2x8x128xf32, #tpu.memory_space<vmem>>, vector<2x8x128xf32>,
    } else {
    }
    return
  }
  func.func @transform_0(%arg0: i32, %arg1: i32) -> (i32, i32) {
    %c0_i32 = arith.constant 0 : i32
    return %arg0, %arg1 : i32, i32
  }
  func.func @transform_1(%arg0: i32, %arg1: i32) -> (i32, i32, i32) {
    %c0_i32 = arith.constant 0 : i32
    %c0_i32_0 = arith.constant 0 : i32
    %c0_i32_1 = arith.constant 0 : i32
    return %c0_i32, %arg1, %c0_i32_0 : i32, i32, i32
  }
  func.func @transform_2(%arg0: i32, %arg1: i32) -> (i32, i32, i32) {
    %c0_i32 = arith.constant 0 : i32
    %c0_i32_0 = arith.constant 0 : i32
    %c0_i32_1 = arith.constant 0 : i32
    return %c0_i32, %arg0, %c0_i32_0 : i32, i32, i32
  }
}

</mosaic_0001>

<bundles_post_ra>
// kernel: graph_conv_layer.3
= control target key start
LH: loop header
LB: loop body
LE: loop exit
PB: predicated region body
PF: predicated region fallthrough
CT: control target
= control target key end

     0   :  { %v242_v2 = vmov 0.0   ;;  %vm21_vm0 = vcmask 64512   ;;  %s274_s0 = inlined_call_operand.vmem [shape: f32[8,8], index: 0, kind: input, shape index: {}]   ;;  %s275_s1 = inlined_call_operand.vmem [shape: f32[2,8,128], index: 1, kind: input, shape index: {}]   ;;  %s276_s2 = inlined_call_operand.hbm [shape: f32[2,8,128], index: 2, kind: output, shape index: {}]  }
   0x1   :  { %v20_v0 = vld [vmem:[%s275_s1] sm:$0xff]  ;;  %v199_v1 = vld [vmem:[%s275_s1 + $0x8] sm:$0xff]  ;;  %205 = vmatprep.subr.mxu0 %v242_v2  ;;  %210 = vmatprep.subr.mxu1 %v242_v2 }
   0x2   :  { %v18_v3 = vld [vmem:[%s274_s0] sm:$0xff] }
   0x3   :  { %7 = vsyncpa [#allocation4], 0  ;;  %206 = vmatpush3.msra.mxu0 %v20_v0  ;;  %vm243_vm1 = vmmov 0   ;;  %211 = vmatpush3.msra.mxu1 %v199_v1  ;;  %s244_s15 = smov [#allocation3]  }
   0x4   :  { %207 = vmatprep.mubr.msk.f32.mxu0 %vm243_vm1, %v242_v2  ;;  %212 = vmatprep.mubr.msk.f32.mxu1 %vm243_vm1, %v242_v2  ;;  %s187_s16 = sshll.u32 %s244_s15, 4  ;;  %s188_s16 = int_to_ptr.vmem [resolvable:$true] %s187_s16 }
   0x5   :  { %208 = vmatmul.mubr.msk.f32.vlgmr.msra.gmra.mxu0 %vm21_vm0, %v18_v3  ;;  %213 = vmatmul.mubr.msk.f32.vlgmr.msra.gmra.mxu1 %vm21_vm0, %v18_v3  ;;  %s220_s0 = scalar_lea.vmem %s188_s16, 256  ;;  %p225_p1 = scmp.lt.s32.totalorder %s188_s16, %s188_s16 }
   0x6   :  { %p221_p0 = scmp.ne.s32.totalorder %s188_s16, %s220_s0  ;;  %p226_p2 = scmp.lt.s32.totalorder %s220_s0, %s220_s0 }
   0x8   :  { %p227_p3 = por %p226_p2, %p225_p1 }
   0xa   :  { %p228_p4 = pnand %p227_p3, %p221_p0 }
  0xc5   :  { %v91_v4 = vpop.f32.mrf.mxu0  ;;  %v167_v5 = vpop.f32.mrf.mxu1 }
  0xc6   :  { %v178_v6 = vmax.f32 %v91_v4, 0.0  ;;  %v179_v7 = vmax.f32 %v167_v5, 0.0 }
  0xc7   :  { %v209_v8 = vpop.f32.mrf.mxu0  ;;  %v214_v9 = vpop.f32.mrf.mxu1 }
  0xc8   :  { %180 = vst [vmem:[#allocation3] sm:$0xff] %v178_v6  ;;  %181 = vst [vmem:[#allocation3 + $0x8] sm:$0xff] %v179_v7 }
  0xc9   :  { %231 = shalt.err (!%p228_p4)
}
  0xca   :  { %s245_s1 = smov 128   ;;  %s246_s17 = smov 8  }
  0xcb   :  { %193 = dma.vmem_to_hbm [thread:$0]  %s188_s16, 256, %s276_s2, [#allocation4], %s245_s1, %s245_s1, %s246_s17  }
  0xcc   :  { %240 = dma.done.wait [#allocation4], 256  }
  0xcd   :  { %241 = vsyncadd [#allocation4], 4294967040 }
  0xce   :  { %197 = vsyncpa [#allocation4], 1 }

// kernel: graph_conv_layer.2
= control target key start
LH: loop header
LB: loop body
LE: loop exit
PB: predicated region body
PF: predicated region fallthrough
CT: control target
= control target key end

     0   :  { %8 = vsyncpa [#allocation3], 0  ;;  %s758_s0 = inlined_call_operand.hbm [shape: f32[2,8,16], index: 0, kind: input, shape index: {}]   ;;  %s759_s1 = inlined_call_operand.hbm [shape: f32[16,128], index: 1, kind: input, shape index: {}]   ;;  %s760_s2 = inlined_call_operand.vmem [shape: f32[1,128], index: 2, kind: input, shape index: {}]   ;;  %s761_s3 = inlined_call_operand.vmem [shape: f32[2,8,128], index: 3, kind: output, shape index: {}]  }
   0x1   :  { %10 = vsyncpa [#allocation3 + $0x1], 0 }
   0x2   :  { %11 = vsyncpa [#allocation5], 0  ;;  %s634_s12 = smov 0   ;;  %s636_s13 = smov 0  }
   0x3   :  { %s638_s14 = smov 0   ;;  %s640_s15 = smov 0  }
   0x4   :  { %s642_s16 = smov 0   ;;  %s644_s17 = smov 0  }
   0x5 LB: > { %s403_s18 = sadd.s32 4294967295, %s606_s17   ;;  %p51_p0 = scmp.ne.s32.totalorder %s590_s13, %s586_s12  ;;  %s606_s17 = sphi %s644_s17, %s17_s17   ;;  %s602_s16 = sphi %s642_s16, %s771_s16   ;;  %s598_s15 = sphi %s640_s15, %s770_s15   ;;  %s594_s14 = sphi %s638_s14, %s769_s14   ;;  %s590_s13 = sphi %s636_s13, %s768_s13   ;;  %s586_s12 = sphi %s634_s12, %s767_s12  }
   0x6   : > { %p664_p1 = scmp.eq.s32.totalorder %s403_s18, 0  ;;  %p405_p2 = scmp.ge.s32.totalorder %s606_s17, 1 }
   0x7   : > { %p132_p3 = scmp.lt.s32.totalorder %s606_s17, 3  ;;  %s608_s22 = smov [#allocation4]  }
   0x8   : > { %p672_p4 = por %p664_p1, %p51_p0  ;;  %s144_s23 = sshll.u32 %s608_s22, 4  ;;  %s145_s23 = int_to_ptr.vmem [resolvable:$true] %s144_s23 }
   0x9   : > { %p676_p5 = pnand %p405_p2, %p132_p3  ;;  %s29_s25 = sadd.s32 1, %s602_s16 }
   0xa   : > { %s509_s26 = scalar_lea.vmem %s145_s23, 256  ;;  %p517_p12 = scmp.lt.s32.totalorder %s145_s23, %s145_s23 }
   0xb   : > { %p434_p6 = pneg %p676_p5  ;;  %p510_p9 = scmp.ne.s32.totalorder %s145_s23, %s509_s26 }
   0xc   : > { %p518_p13 = scmp.lt.s32.totalorder %s509_s26, %s509_s26 }
   0xd   : > { %p684_p7 = pnand %p434_p6, %p664_p1 }
   0xe   : > { %p519_p0 = por %p518_p13, %p517_p12 }
   0xf   : > { %p500_p8 = pneg %p684_p7 }
  0x11   : > { %p512_p10 = pnand %p510_p9, %p500_p8 }
  0x13   : > { %p513_p11 = pneg %p512_p10 }
  0x15   : > { %p520_p2 = pnand %p519_p0, %p513_p11 }
  0x17   : > { %523 = shalt.err (!%p520_p2)
}
  0x18   : > { %s609_s27 = smov 128   ;;  %s610_s28 = smov 8  }
  0x19   : > { %437 = dma.hbm_to_vmem [thread:$0]  (!%p684_p7), %s759_s1, 256, %s145_s23, [#allocation5], %s609_s27, %s609_s27, %s610_s28  }
  0x1a   : > { %p31_p3 = scmp.ge.s32.totalorder %s29_s25, 2  ;;  %s38_s4 = sadd.s32 1, %s594_s14 }
  0x1b   : > { %p45_p6 = scmp.ne.s32.totalorder %s594_s14, %s590_s13  ;;  %p46_p8 = scmp.eq.s32.totalorder %s606_s17, 0 }
  0x1c   : > { %s773_s25 = smov (%p31_p3, %s29_s25), 0  ;;  %p443_p10 = scmp.lt.s32.totalorder %s606_s17, 2 }
  0x1d   : > { %p47_p9 = por %p46_p8, %p45_p6  ;;  %s33_s5 = ssub.s32 %s602_s16, %s773_s25 }
  0x1e   : > { %s161_s6 = sand.u32 1, %s594_s14   ;;  %p36_p11 = scmp.eq.s32.totalorder %s33_s5, 0 }
  0x1f   : > { %s408_s7 = sshll.u32 %s161_s6, 3  ;;  %s409_s8 = sshll.u32 %s602_s16, 7 }
  0x20   : > { %s708_s9 = scalar_select %p36_p11, %s594_s14, %s38_s4  }
  0x21   : > { %s171_s12 = scalar_lea.hbm %s758_s0, %s409_s8  ;;  %s165_s18 = scalar_lea.vmem [#allocation2], %s408_s7 }
  0x22   : > { %s173_s22 = sshll.u32 %s165_s18, 4  ;;  %p713_p7 = pnand %p443_p10, %p47_p9  ;;  %s174_s22 = int_to_ptr.vmem [resolvable:$true] %s173_s22 }
  0x23   : > { %s162_s24 = scalar_lea.sflag [#allocation3], %s161_s6  ;;  %s537_s26 = scalar_lea.vmem %s174_s22, 128 }
  0x24   : > { %p526_p12 = pneg %p713_p7  ;;  %p538_p13 = scmp.ne.s32.totalorder %s174_s22, %s537_s26 }
  0x25   : > { %s611_s27 = smov [#allocation2]  }
  0x26   : > { %p540_p0 = pnand %p538_p13, %p526_p12  ;;  %s542_s28 = sshll.u32 %s611_s27, 4  ;;  %s543_s28 = int_to_ptr.vmem [resolvable:$false] %s542_s28 }
  0x27   : > { %s544_s29 = scalar_lea.vmem %s543_s28, 256  ;;  %p545_p3 = scmp.lt.s32.totalorder %s174_s22, %s543_s28 }
  0x28   : > { %p541_p2 = pneg %p540_p0  ;;  %p546_p6 = scmp.lt.s32.totalorder %s544_s29, %s537_s26 }
  0x2a   : > { %p547_p8 = por %p546_p6, %p545_p3 }
  0x2c   : > { %p548_p9 = pnand %p547_p8, %p541_p2 }
  0x2e   : > { %551 = shalt.err (!%p548_p9)
}
  0x2f   : > { %441 = dma.hbm_to_vmem [thread:$0]  (!%p713_p7), %s171_s12, 128, %s174_s22, %s162_s24  }
  0x30   : > { %182 = sbr.rel (%p676_p5) target bundleno = 257 (0x101), region = 32  ;;  %s184_s30 = sand.u32 (!%p676_p5), 1, %s590_s13  }
  0x31   : > { %s411_s4 = sshll.u32 (!%p676_p5), %s184_s30, 3  ;;  %s185_s5 = scalar_lea.sflag (!%p676_p5), [#allocation3], %s184_s30 }
  0x32   : > { %s188_s6 = scalar_lea.vmem (!%p676_p5), [#allocation2], %s411_s4 }
  0x35   : > { %577 = dma.done.wait (%p672_p4), %s185_s5, 128  }
  0x36   : > { %579 = vsyncadd (%p672_p4), %s185_s5, 4294967168 }
  0x37   : > { %581 = dma.done.wait (%p664_p1), [#allocation5], 256  }
  0x38   : > { %583 = vsyncadd (%p664_p1), [#allocation5], 4294967040  ;;  %v612_v0 = vmov 0.0   ;;  %vm613_vm0 = vmmov 0   ;;  %v226_v1 = vld [vmem:[#allocation4 + $0x8] sm:$0xff]  ;;  %v225_v2 = vld [vmem:[#allocation4] sm:$0xff] }
  0x39   : > { %421 = vmatprep.subr.mxu0 %v612_v0  ;;  %425 = vmatprep.mubr.msk.f32.mxu0 %vm613_vm0, %v612_v0  ;;  %v224_v3 = vld [vmem:[%s188_s6] sm:$0xff]  ;;  %vm234_vm1 = vcmask 130048   ;;  %p217_p4 = scmp.lt.s32.totalorder %s598_s15, 1 }
  0x3a   : > { %422 = vmatpush3.msra.mxu0 %v226_v1  ;;  %v414_v4 = vld [vmem:[%s760_s2] ss:$0 sm:$0xff] }
  0x3b   : > { %423 = vmatprep.subr.mxu0 %v612_v0  ;;  %s775_s15 = smov (!%p217_p4, %s598_s15), 1 }
  0x3c   : > { %424 = vmatpush3.msra.mxu0 %v225_v2  ;;  %s413_s20 = sshll.u32 %s775_s15, 3 }
  0x3d   : > { %426 = vmatmul.mubr.msk.f32.vlgmr.msra.gmra.mxu0 %vm234_vm1, %v224_v3  ;;  %s223_s10 = scalar_lea.vmem %s761_s3, %s413_s20 }
  0xfd   : > { %v304_v5 = vpop.f32.mrf.mxu0 }
  0xfe   : > { %v305_v6 = vadd.f32 %v414_v4, %v304_v5 }
  0xff   : > { %v427_v7 = vpop.f32.mrf.mxu0 }
 0x100   : > { %308 = vst [vmem:[%s223_s10] sm:$0xff] %v305_v6 }
 0x101 PF: > { %s17_s17 = sadd.s32 1, %s606_s17   ;;  %s767_s12 = smov %s590_s13 }
 0x102   : > { %p14_p1 = scmp.ge.s32.totalorder %s17_s17, 4   ;;  %s768_s13 = smov %s594_s14 }
 0x103   : > { %s769_s14 = smov %s708_s9  ;;  %s770_s15 = smov %s602_s16 }
 0x104   : > { %s771_s16 = smov %s773_s25  ;;  %16 = sbr.rel (!%p14_p1) target bundleno = 5 (0x5), region = 76 }
 0x109   :  { %334 = vsyncpa [#allocation3], 1 }
 0x10a   :  { %336 = vsyncpa [#allocation3 + $0x1], 1 }
 0x10b   :  { %337 = vsyncpa [#allocation5], 1 }

</bundles_post_ra>
